<compile_context>
chip_gen: v6e
topology: v6e:2x2x1
jax: 0.10.0
libtpu: 0.0.40
codegen_flags: <defaults>
</compile_context>

<pallas_src>
import functools

import jax
import jax.numpy as jnp
from jax.experimental import pallas as pl
from jax.experimental.pallas import tpu as pltpu

_LANE = 128
_MAX_TILE_B = 2048        # batch rows per grid step (fits easily in v7x 64 MiB VMEM)
_SPLIT_BATCH = 512        # batch >= this -> at least 2 grid steps (v7x megacore)


def _round_up(x, m):
    return (x + m - 1) // m * m


def _choose_batch_tiling(batch):
    """Pick (tile_b, n_tiles) minimising padding waste, with >=2 steps for big batches."""
    align = 256 if batch >= 256 else 8          # 256-wide MXU on v6e/v7x; 8 is enough small
    n_tiles = pl.cdiv(batch, _MAX_TILE_B)
    if batch >= _SPLIT_BATCH:
        n_tiles = max(n_tiles, 2)               # shard over v7x's 2 TensorCores
    tile_b = _round_up(pl.cdiv(batch, n_tiles), align)
    tile_b = min(tile_b, _round_up(batch, 8))   # never blow a whole tile past the batch
    n_tiles = pl.cdiv(batch, tile_b)
    return tile_b, n_tiles


def _discriminator_kernel(x_ref, w1_ref, b1_ref, w2_ref, b2_ref, o_ref, *, alpha):
    # fc1 on the MXU: (tile_b, K) @ (K, H_pad), f32 accumulation.
    x = x_ref[...]
    if x.dtype != w1_ref.dtype:                 # cast in VMEM only if needed (no HBM pass)
        x = x.astype(w1_ref.dtype)
    h = jnp.dot(x, w1_ref[...], preferred_element_type=jnp.float32)
    h = h + b1_ref[...]                         # (tile_b, H_pad) + (1, H_pad)
    h = jnp.maximum(h, alpha * h)               # leaky_relu as mul+max (alpha in [0,1])

    # fc2 head (n_output == 1): standard-orientation contraction h @ w2_col
    # -> (tile_b, 1). w2 stays f32 (no bf16 cast of h); tiny output, so the
    # lane-width-1 store is negligible.
    z = jnp.dot(h, w2_ref[...], preferred_element_type=jnp.float32)
    z = z + b2_ref[0]                           # scalar bias from SMEM

    # Exact sigmoid (exp on the EUP); output dtype f32.
    o_ref[...] = (1.0 / (1.0 + jnp.exp(-z))).astype(o_ref.dtype)


def prepare_discriminator_params(w1, b1, w2, b2, *, compute_dtype=jnp.bfloat16):
    """One-time parameter prep (hoisted out of the per-step forward).

    w1: (n_hidden, input_size) -> (input_size, H_pad), transposed, H zero-padded,
        cast to compute_dtype (bf16 recommended on v5e/v6e/v7x alike).
    b1: (n_hidden,)            -> (1, H_pad) f32
    w2: (1, n_hidden)          -> (H_pad, 1) f32 column (f32 head, no h cast)
    b2: (1,)                   -> (1,) f32 scalar (SMEM)
    """
    n_hidden, input_size = w1.shape
    n_output = w2.shape[0]
    assert n_output == 1, "kernel specialises the GAN discriminator head (n_output == 1)"
    assert w2.shape[1] == n_hidden

    h_pad = _round_up(n_hidden, _LANE)

    w1_t = jnp.zeros((input_size, h_pad), compute_dtype)
    w1_t = w1_t.at[:, :n_hidden].set(jnp.asarray(w1, compute_dtype).T)
    b1_r = jnp.zeros((1, h_pad), jnp.float32)
    b1_r = b1_r.at[:, :n_hidden].set(jnp.asarray(b1, jnp.float32)[None, :])
    w2_c = jnp.zeros((h_pad, 1), jnp.float32)
    w2_c = w2_c.at[:n_hidden, :].set(jnp.asarray(w2, jnp.float32).T)
    b2_s = jnp.asarray(b2, jnp.float32).reshape((1,))
    return w1_t, b1_r, w2_c, b2_s


@functools.partial(jax.jit, static_argnames=("alpha",))
def discriminator_forward(x, w1_t, b1_r, w2_c, b2_s, *, alpha=0.2):
    """x: (B, input_size), streamed unpadded (f32 or bf16 -- bf16 halves HBM traffic).
    Params from prepare_discriminator_params. Returns (B, 1) f32 probabilities."""
    assert 0.0 <= alpha <= 1.0, "leaky_relu as mul+max requires alpha in [0, 1]"
    batch, input_size = x.shape
    k_w, h_pad = w1_t.shape
    assert k_w == input_size, "w1 was prepared for a different input_size"

    tile_b, n_tiles = _choose_batch_tiling(batch)

    # VMEM budget: double-buffered x tiles + resident weights + f32 activations.
    x_itm = jnp.dtype(x.dtype).itemsize
    w_itm = jnp.dtype(w1_t.dtype).itemsize
    vmem_bytes = (2 * tile_b * input_size * x_itm   # x (double buffered)
                  + 2 * input_size * h_pad * w_itm  # w1 (resident)
                  + 4 * h_pad * 4                   # b1 row + w2 column (f32)
                  + tile_b * h_pad * 4              # f32 hidden activations
                  + 2 * tile_b * 4)                 # output tiles
    vmem_limit = int(min(max(2 * vmem_bytes, 32 << 20), 48 << 20))  # cap below v7x 64 MiB

    flops = 2 * batch * input_size * h_pad + 2 * batch * h_pad
    bytes_accessed = (batch * input_size * x_itm
                      + input_size * h_pad * w_itm
                      + 2 * h_pad * 4
                      + batch * 4)

    out = pl.pallas_call(
        functools.partial(_discriminator_kernel, alpha=alpha),
        out_shape=jax.ShapeDtypeStruct((batch, 1), jnp.float32),
        grid=(n_tiles,),
        in_specs=[
            pl.BlockSpec((tile_b, input_size), lambda i: (i, 0)),   # x tile (pipelined)
            pl.BlockSpec((input_size, h_pad), lambda i: (0, 0)),    # w1 (VMEM resident)
            pl.BlockSpec((1, h_pad), lambda i: (0, 0)),             # b1 (resident)
            pl.BlockSpec((h_pad, 1), lambda i: (0, 0)),             # w2 column (resident)
            pl.BlockSpec(memory_space=pltpu.MemorySpace.SMEM),      # b2 scalar
        ],
        out_specs=pl.BlockSpec((tile_b, 1), lambda i: (i, 0)),
        compiler_params=pltpu.CompilerParams(
            dimension_semantics=("parallel",),
            vmem_limit_bytes=vmem_limit,
        ),
        cost_estimate=pl.CostEstimate(
            flops=int(flops),
            transcendentals=int(batch),
            bytes_accessed=int(bytes_accessed),
        ),
    )(x, w1_t, b1_r, w2_c, b2_s)
    return out


def xavier_uniform(key, fan_out, fan_in, dtype=jnp.float32):
    # Matches torch.nn.init.xavier_uniform (gain=1): U(-a, a), a = sqrt(6/(fan_in+fan_out))
    a = (6.0 / (fan_in + fan_out)) ** 0.5
    return jax.random.uniform(key, (fan_out, fan_in), dtype, minval=-a, maxval=a)


if __name__ == "__main__":
    # Small shapes consistent with the module: flattened-image input -> hidden -> 1.
    batch = 8
    input_size = 64
    n_hidden = 128
    n_output = 1
    alpha = 0.2

    key = jax.random.PRNGKey(0)
    kx, k1, k2 = jax.random.split(key, 3)

    x = jax.random.normal(kx, (batch, input_size), jnp.float32)
    w1 = xavier_uniform(k1, n_hidden, input_size)     # fc1.weight: (n_hidden, input_size)
    b1 = jnp.zeros((n_hidden,), jnp.float32)          # fc1.bias: init.constant(_, 0)
    w2 = xavier_uniform(k2, n_output, n_hidden)       # fc2.weight: (n_output, n_hidden)
    b2 = jnp.zeros((n_output,), jnp.float32)          # fc2.bias

    # Pure-JAX reference of the same math.
    h_ref = x @ w1.T + b1
    h_ref = jnp.where(h_ref >= 0, h_ref, alpha * h_ref)
    ref = jax.nn.sigmoid(h_ref @ w2.T + b2)

    # f32 path (exact sigmoid) -> tight tolerance.
    params_f32 = prepare_discriminator_params(w1, b1, w2, b2, compute_dtype=jnp.float32)
    out = jax.block_until_ready(discriminator_forward(x, *params_f32, alpha=alpha))
    assert out.shape == (batch, n_output)
    assert jnp.allclose(out, ref, atol=5e-4, rtol=5e-4), float(jnp.max(jnp.abs(out - ref)))

    # bf16 streaming path (recommended on all generations): x supplied in bf16,
    # weights prepared in bf16, epilogue stays f32.
    params_bf16 = prepare_discriminator_params(w1, b1, w2, b2, compute_dtype=jnp.bfloat16)
    out16 = jax.block_until_ready(
        discriminator_forward(x.astype(jnp.bfloat16), *params_bf16, alpha=alpha))
    assert out16.shape == (batch, n_output)
    assert jnp.allclose(out16, ref, atol=5e-2, rtol=5e-2)

    print("KERNEL_OK")
</pallas_src>

<mosaic_0001>
module attributes {stable_mosaic.version = 11 : i64} {
  func.func @_discriminator_kernel(%arg0: i32, %arg1: memref<8x64xf32, #tpu.memory_space<vmem>>, %arg2: memref<64x128xf32, #tpu.memory_space<vmem>>, %arg3: memref<1x128xf32, #tpu.memory_space<vmem>>, %arg4: memref<128x1xf32, #tpu.memory_space<vmem>>, %arg5: memref<1xf32, #tpu.memory_space<smem>>, %arg6: memref<8x1xf32, #tpu.memory_space<vmem>>) attributes {dimension_semantics = [#tpu.dimension_semantics<parallel>], iteration_bounds = array<i64: 1>, scalar_prefetch = 0 : i64, scratch_operands = 0 : i64, tpu.core_type = #tpu.core_type<tc>, window_params = [{transform_indices = @transform_0, window_bounds = array<i64: 8, 64>}, {pipeline_mode = #tpu.pipeline_mode<synchronous>, transform_indices = @transform_1, window_bounds = array<i64: 64, 128>}, {pipeline_mode = #tpu.pipeline_mode<synchronous>, transform_indices = @transform_2, window_bounds = array<i64: 1, 128>}, {pipeline_mode = #tpu.pipeline_mode<synchronous>, transform_indices = @transform_3, window_bounds = array<i64: 128, 1>}, {transform_indices = @transform_4, window_bounds = array<i64: 1>}, {transform_indices = @transform_5, window_bounds = array<i64: 8, 1>}]} {
    %c0 = arith.constant 0 : index
    %c0_0 = arith.constant 0 : index
    %0 = vector.load %arg1[%c0, %c0_0] : memref<8x64xf32, #tpu.memory_space<vmem>>, vector<8x64xf32>
    %c0_1 = arith.constant 0 : index
    %c0_2 = arith.constant 0 : index
    %1 = vector.load %arg2[%c0_1, %c0_2] : memref<64x128xf32, #tpu.memory_space<vmem>>, vector<64x128xf32>
    %cst = arith.constant dense<0.000000e+00> : vector<8x128xf32>
    %2 = tpu.matmul %0, %1, %cst {dimension_numbers = #tpu.dot_dimension_numbers<[1], [0], [0], [1], [0, 0, 1, 1], [], []>} : vector<8x64xf32>, vector<64x128xf32>, vector<8x128xf32> -> vector<8x128xf32>
    %c0_3 = arith.constant 0 : index
    %c0_4 = arith.constant 0 : index
    %3 = vector.load %arg3[%c0_3, %c0_4] : memref<1x128xf32, #tpu.memory_space<vmem>>, vector<1x128xf32>
    %4 = vector.broadcast %3 : vector<1x128xf32> to vector<8x128xf32>
    %5 = arith.addf %2, %4 : vector<8x128xf32>
    %cst_5 = arith.constant 2.000000e-01 : f32
    %6 = vector.broadcast %cst_5 : f32 to vector<8x128xf32>
    %7 = arith.mulf %6, %5 : vector<8x128xf32>
    %8 = arith.maximumf %5, %7 : vector<8x128xf32>
    %c0_6 = arith.constant 0 : index
    %c0_7 = arith.constant 0 : index
    %9 = vector.load %arg4[%c0_6, %c0_7] : memref<128x1xf32, #tpu.memory_space<vmem>>, vector<128x1xf32>
    %cst_8 = arith.constant dense<0.000000e+00> : vector<8x1xf32>
    %10 = tpu.matmul %8, %9, %cst_8 {dimension_numbers = #tpu.dot_dimension_numbers<[1], [0], [0], [1], [0, 0, 1, 1], [], []>} : vector<8x128xf32>, vector<128x1xf32>, vector<8x1xf32> -> vector<8x1xf32>
    %c0_9 = arith.constant 0 : index
    %11 = memref.load %arg5[%c0_9] : memref<1xf32, #tpu.memory_space<smem>>
    %12 = vector.broadcast %11 : f32 to vector<8x1xf32>
    %13 = arith.addf %10, %12 : vector<8x1xf32>
    %cst_10 = arith.constant 0.000000e+00 : f32
    %14 = vector.broadcast %cst_10 : f32 to vector<8x1xf32>
    %15 = arith.subf %14, %13 : vector<8x1xf32>
    %16 = math.exp %15 : vector<8x1xf32>
    %cst_11 = arith.constant 1.000000e+00 : f32
    %17 = vector.broadcast %cst_11 : f32 to vector<8x1xf32>
    %18 = arith.addf %17, %16 : vector<8x1xf32>
    %cst_12 = arith.constant 1.000000e+00 : f32
    %19 = vector.broadcast %cst_12 : f32 to vector<8x1xf32>
    %20 = arith.divf %19, %18 : vector<8x1xf32>
    %c0_13 = arith.constant 0 : index
    %c0_14 = arith.constant 0 : index
    %21 = vector.load %arg6[%c0_13, %c0_14] : memref<8x1xf32, #tpu.memory_space<vmem>>, vector<8x1xf32>
    tpu.vector_store %arg6[%c0_13, %c0_14], %20 {strides = array<i32>} : memref<8x1xf32, #tpu.memory_space<vmem>>, vector<8x1xf32>,
    return
  }
  func.func @transform_0(%arg0: i32) -> (i32, i32) {
    %c0_i32 = arith.constant 0 : i32
    %c0_i32_0 = arith.constant 0 : i32
    return %arg0, %c0_i32 : i32, i32
  }
  func.func @transform_1(%arg0: i32) -> (i32, i32) {
    %c0_i32 = arith.constant 0 : i32
    %c0_i32_0 = arith.constant 0 : i32
    %c0_i32_1 = arith.constant 0 : i32
    return %c0_i32, %c0_i32_0 : i32, i32
  }
  func.func @transform_2(%arg0: i32) -> (i32, i32) {
    %c0_i32 = arith.constant 0 : i32
    %c0_i32_0 = arith.constant 0 : i32
    %c0_i32_1 = arith.constant 0 : i32
    return %c0_i32, %c0_i32_0 : i32, i32
  }
  func.func @transform_3(%arg0: i32) -> (i32, i32) {
    %c0_i32 = arith.constant 0 : i32
    %c0_i32_0 = arith.constant 0 : i32
    %c0_i32_1 = arith.constant 0 : i32
    return %c0_i32, %c0_i32_0 : i32, i32
  }
  func.func @transform_4(%arg0: i32) -> i32 {
    %c0_i32 = arith.constant 0 : i32
    %c0_i32_0 = arith.constant 0 : i32
    return %c0_i32 : i32
  }
  func.func @transform_5(%arg0: i32) -> (i32, i32) {
    %c0_i32 = arith.constant 0 : i32
    %c0_i32_0 = arith.constant 0 : i32
    return %arg0, %c0_i32 : i32, i32
  }
}

</mosaic_0001>

<bundles_post_ra>
// kernel: discriminator_forward.1
= control target key start
LH: loop header
LB: loop body
LE: loop exit
PB: predicated region body
PF: predicated region fallthrough
CT: control target
= control target key end

     0   :  { %v301_v0 = vmov 0.0   ;;  %vm302_vm0 = vmmov 0   ;;  %vm37_vm1 = vcmask 523264   ;;  %vm207_vm2 = vcmask 7168   ;;  %s443_s1 = inlined_call_operand.vmem [shape: f32[64,128], index: 1, kind: input, shape index: {}]   ;;  %s444_s3 = inlined_call_operand.vmem [shape: f32[128,1], index: 3, kind: input, shape index: {}]   ;;  %s445_s0 = inlined_call_operand.vmem [shape: f32[8,64], index: 0, kind: input, shape index: {}]   ;;  %s446_s2 = inlined_call_operand.vmem [shape: f32[1,128], index: 2, kind: input, shape index: {}]   ;;  %s447_s4 = inlined_call_operand.<no memory space> [shape: f32[1], index: 4, kind: input, shape index: {}]   ;;  %s448_s5 = inlined_call_operand.vmem [shape: f32[8,1], index: 5, kind: output, shape index: {}]  }
   0x1   :  { %241 = vmatprep.subr.mxu0 %v301_v0  ;;  %v29_v1 = vld [vmem:[%s443_s1 + $0x38] sm:$0xff]  ;;  %v28_v2 = vld [vmem:[%s443_s1 + $0x30] sm:$0xff]  ;;  %257 = vmatprep.mubr.msk.f32.mxu0 %vm302_vm0, %v301_v0  ;;  %v27_v3 = vld [vmem:[%s443_s1 + $0x28] sm:$0xff]  ;;  %v130_v32 = vstv %s447_s4 }
   0x2   :  { %242 = vmatpush3.msra.mxu0 %v29_v1  ;;  %260 = vmatprep.subr.mxu1 %v301_v0  ;;  %v128_v4 = vld [vmem:[%s444_s3 + $0x78] sm:$0xff]  ;;  %v127_v5 = vld [vmem:[%s444_s3 + $0x70] sm:$0xff]  ;;  %v26_v6 = vld [vmem:[%s443_s1 + $0x20] sm:$0xff] }
   0x3   :  { %243 = vmatprep.subr.mxu0 %v301_v0  ;;  %292 = vmatprep.mubr.msk.f32.mxu1 %vm302_vm0, %v301_v0  ;;  %v126_v7 = vld [vmem:[%s444_s3 + $0x68] sm:$0xff]  ;;  %v25_v8 = vld [vmem:[%s443_s1 + $0x18] sm:$0xff]  ;;  %v125_v9 = vld [vmem:[%s444_s3 + $0x60] sm:$0xff] }
   0x4   :  { %244 = vmatpush3.msra.mxu0 %v28_v2  ;;  %261 = vmatpush3.msra.mxu1 %v128_v4  ;;  %v24_v10 = vld [vmem:[%s443_s1 + $0x10] sm:$0xff]  ;;  %v124_v11 = vld [vmem:[%s444_s3 + $0x58] sm:$0xff]  ;;  %v23_v12 = vld [vmem:[%s443_s1 + $0x8] sm:$0xff] }
   0x5   :  { %245 = vmatprep.subr.mxu0 %v301_v0  ;;  %262 = vmatprep.subr.mxu1 %v301_v0  ;;  %v123_v13 = vld [vmem:[%s444_s3 + $0x50] sm:$0xff]  ;;  %v22_v14 = vld [vmem:[%s443_s1] sm:$0xff]  ;;  %v122_v16 = vld [vmem:[%s444_s3 + $0x48] sm:$0xff] }
   0x6   :  { %246 = vmatpush3.msra.mxu0 %v27_v3  ;;  %263 = vmatpush3.msra.mxu1 %v127_v5  ;;  %v21_v15 = vld [vmem:[%s445_s0] sm:$0xff]  ;;  %v120_v18 = vld [vmem:[%s444_s3 + $0x38] sm:$0xff]  ;;  %v119_v19 = vld [vmem:[%s444_s3 + $0x30] sm:$0xff] }
   0x7   :  { %247 = vmatprep.subr.mxu0 %v301_v0  ;;  %264 = vmatprep.subr.mxu1 %v301_v0  ;;  %v121_v17 = vld [vmem:[%s444_s3 + $0x40] sm:$0xff]  ;;  %v118_v20 = vld [vmem:[%s444_s3 + $0x28] sm:$0xff]  ;;  %v116_v22 = vld [vmem:[%s444_s3 + $0x18] sm:$0xff] }
   0x8   :  { %248 = vmatpush3.msra.mxu0 %v26_v6  ;;  %265 = vmatpush3.msra.mxu1 %v126_v7  ;;  %v117_v21 = vld [vmem:[%s444_s3 + $0x20] sm:$0xff]  ;;  %v115_v23 = vld [vmem:[%s444_s3 + $0x10] sm:$0xff]  ;;  %v114_v24 = vld [vmem:[%s444_s3 + $0x8] sm:$0xff] }
   0x9   :  { %249 = vmatprep.subr.mxu0 %v301_v0  ;;  %266 = vmatprep.subr.mxu1 %v301_v0  ;;  %v113_v25 = vld [vmem:[%s444_s3] sm:$0xff] }
   0xa   :  { %250 = vmatpush3.msra.mxu0 %v25_v8  ;;  %267 = vmatpush3.msra.mxu1 %v125_v9  ;;  %v213_v26 = vld [vmem:[%s446_s2] ss:$0 sm:$0xff] }
   0xb   :  { %251 = vmatprep.subr.mxu0 %v301_v0  ;;  %268 = vmatprep.subr.mxu1 %v301_v0 }
   0xc   :  { %252 = vmatpush3.msra.mxu0 %v24_v10  ;;  %269 = vmatpush3.msra.mxu1 %v124_v11 }
   0xd   :  { %253 = vmatprep.subr.mxu0 %v301_v0  ;;  %270 = vmatprep.subr.mxu1 %v301_v0 }
   0xe   :  { %254 = vmatpush3.msra.mxu0 %v23_v12  ;;  %271 = vmatpush3.msra.mxu1 %v123_v13 }
   0xf   :  { %255 = vmatprep.subr.mxu0 %v301_v0  ;;  %272 = vmatprep.subr.mxu1 %v301_v0 }
  0x10   :  { %256 = vmatpush3.msra.mxu0 %v22_v14  ;;  %273 = vmatpush3.msra.mxu1 %v122_v16 }
  0x11   :  { %258 = vmatmul.mubr.msk.f32.vlgmr.msra.gmra.mxu0 %vm37_vm1, %v21_v15  ;;  %274 = vmatprep.subr.mxu1 %v301_v0 }
  0x12   :  { %275 = vmatpush3.msra.mxu1 %v121_v17 }
  0x13   :  { %276 = vmatprep.subr.mxu1 %v301_v0 }
  0x14   :  { %277 = vmatpush3.msra.mxu1 %v120_v18 }
  0x15   :  { %278 = vmatprep.subr.mxu1 %v301_v0 }
  0x16   :  { %279 = vmatpush3.msra.mxu1 %v119_v19 }
  0x17   :  { %280 = vmatprep.subr.mxu1 %v301_v0 }
  0x18   :  { %281 = vmatpush3.msra.mxu1 %v118_v20 }
  0x19   :  { %282 = vmatprep.subr.mxu1 %v301_v0 }
  0x1a   :  { %283 = vmatpush3.msra.mxu1 %v117_v21 }
  0x1b   :  { %284 = vmatprep.subr.mxu1 %v301_v0 }
  0x1c   :  { %285 = vmatpush3.msra.mxu1 %v116_v22 }
  0x1d   :  { %286 = vmatprep.subr.mxu1 %v301_v0 }
  0x1e   :  { %287 = vmatpush3.msra.mxu1 %v115_v23 }
  0x1f   :  { %288 = vmatprep.subr.mxu1 %v301_v0 }
  0x20   :  { %289 = vmatpush3.msra.mxu1 %v114_v24 }
  0x21   :  { %290 = vmatprep.subr.mxu1 %v301_v0 }
  0x22   :  { %291 = vmatpush3.msra.mxu1 %v113_v25 }
  0xd1   :  { %v107_v27 = vpop.f32.mrf.mxu0 }
  0xd2   :  { %v108_v28 = vadd.f32 %v213_v26, %v107_v27 }
  0xd3   :  { %v259_v29 = vpop.f32.mrf.mxu0 }
  0xd4   :  { %v111_v30 = vmul.f32 0.2, %v108_v28 }
  0xd6   :  { %v112_v31 = vmax.f32 %v108_v28, %v111_v30 }
  0xd8   :  { %293 = vmatmul.mubr.f32.vlgmr.msra.gmra.mxu1 %v112_v31 }
 0x198   :  { %v197_v33 = vpop.f32.mrf.mxu1 }
 0x199   :  { %v198_v34 = vadd.f32 %v197_v33, %v130_v32 }
 0x19a   :  { %v294_v35 = vpop.f32.mrf.mxu1 }
 0x19b   :  { %v201_v36 = vsub.f32 0.0, %v198_v34 }
 0x19d   :  { %v202_v37 = vmul.f32 1.442695, %v201_v36 }
 0x19f   :  { %297 = vpow2.f32 %v202_v37 }
 0x1ac   :  { %v298_v38 = vpop.eup %297 }
 0x1ad   :  { %v204_v39 = vadd.f32 1.0, %v298_v38 }
 0x1af   :  { %299 = vrcp.f32 %v204_v39 }
 0x1bc   :  { %v300_v40 = vpop.eup %299 }
 0x1bd   :  { %208 = vst.msk [vmem:[%s448_s5] sm:$0xff] %vm207_vm2, %v300_v40 }

</bundles_post_ra>
